<compile_context>
chip_gen: v7x
topology: tpu7x:2x2x1
jax: 0.10.0
libtpu: 0.0.40
codegen_flags: <defaults>
</compile_context>

<pallas_src>
import functools

import jax
import jax.numpy as jnp
from jax import lax
from jax.experimental import pallas as pl
from jax.experimental.pallas import tpu as pltpu


def _round_up(x, m):
    return (x + m - 1) // m * m


def _focal_loss_kernel(logits_ref, targets_ref, alpha_ref, out_ref, acc_ref, *,
                       n_total, tile_n, per_core, gamma):
    """One (C, TILE) block: classes on sublanes, batch columns on lanes."""
    j = pl.program_id(1)

    @pl.when(j == 0)
    def _init():
        acc_ref[...] = jnp.zeros_like(acc_ref)

    x = logits_ref[...]                       # (C, TILE)
    if x.dtype != jnp.float32:                # bf16 inputs -> f32 math
        x = x.astype(jnp.float32)
    t = targets_ref[...]                      # (1, TILE) int32
    c, tn = x.shape

    # one-hot of the target class along the (sublane) class axis
    cls = lax.broadcasted_iota(jnp.int32, (c, tn), 0)
    onehot = cls == t                         # (C, TILE) bool

    # numerically stable log-sum-exp over classes (short sublane reduces)
    m = jnp.max(x, axis=0, keepdims=True)                        # (1, TILE)
    se = jnp.sum(jnp.exp(x - m), axis=0, keepdims=True)          # (1, TILE)
    lse = m + jnp.log(se)

    # gather target logit and per-class alpha via select + sum (no (N,C) divide)
    x_t = jnp.sum(jnp.where(onehot, x, 0.0), axis=0, keepdims=True)
    a_t = jnp.sum(jnp.where(onehot, alpha_ref[...], 0.0), axis=0, keepdims=True)

    log_p = x_t - lse                         # log softmax prob of target class
    p_t = jnp.exp(log_p)

    # focal weight (1 - p)^gamma; gamma is static (gamma=2 -> explicit square)
    one_minus = 1.0 - p_t
    if float(gamma) == float(int(gamma)) and int(gamma) >= 0:
        fw = jnp.ones_like(one_minus)
        for _ in range(int(gamma)):
            fw = fw * one_minus
    else:
        fw = jnp.power(one_minus, jnp.float32(gamma))

    per_col = -a_t * fw * log_p               # (1, TILE)

    # logical (unclamped) position of this block in the batch
    tile_idx = pl.program_id(0) * per_core + j
    block_start = tile_idx * tile_n
    in_bounds = block_start + tile_n <= n_total

    @pl.when(in_bounds)
    def _accumulate_full():
        acc_ref[...] += per_col

    @pl.when(jnp.logical_not(in_bounds))
    def _accumulate_masked():
        # select (not multiply), so garbage/NaN in padded columns cannot leak
        col = lax.broadcasted_iota(jnp.int32, (1, tn), 1) + block_start
        acc_ref[...] += jnp.where(col < n_total, per_col, 0.0)

    @pl.when(j == per_core - 1)
    def _finalize():
        total = jnp.sum(acc_ref[...])                       # one tree reduce
        out_ref[...] = jnp.broadcast_to(jnp.reshape(total, (1, 1)), out_ref.shape)


def focal_loss(logits, targets, alpha=None, gamma=2, *, reduction="mean",
               logits_layout="nc", tile_n=32768, num_core_splits=2,
               vmem_limit_bytes=48 * 1024 * 1024, allow_input_fusion=False):
    """Focal loss forward.

    logits : (N, C) if logits_layout == "nc" (default, matches the PyTorch
             module) or (C, N) if logits_layout == "cn" (fast path: no wrapper
             transpose / extra HBM pass).  f32 or bf16.
    targets: (N,) integer class ids.
    alpha  : (C,) per-class weights or None (-> ones, like torch.ones(C, 1)).
    Returns a scalar f32 (mean or sum over the batch).
    """
    if logits_layout == "cn":
        logits_cn = logits
        c, n = logits_cn.shape
    else:
        n, c = logits.shape
        # NOTE: this transpose is an extra HBM pass; pass (C, N) logits with
        # logits_layout="cn" (or enable allow_input_fusion) to avoid it.
        logits_cn = jnp.transpose(logits, (1, 0))

    if alpha is None:
        alpha = jnp.ones((c,), dtype=jnp.float32)
    alpha_2d = jnp.asarray(alpha, dtype=jnp.float32).reshape(c, 1)
    targets_2d = jnp.asarray(targets, dtype=jnp.int32).reshape(1, n)

    # --- tile sizing (lane axis = batch) -------------------------------------
    # Multiple of 128 (BlockSpec rule), capped by tile_n, and no bigger than a
    # per-core share so medium batches still use both v7x TensorCores.  For
    # n <= tile the block collapses to exactly n (block == full dim is legal).
    tile = max(128, (int(tile_n) // 128) * 128)
    per_core_target = _round_up(pl.cdiv(n, num_core_splits), 128)
    tile = min(tile, per_core_target)
    if tile >= n:
        tile = n
    grid_n = pl.cdiv(n, tile)
    per_core = pl.cdiv(grid_n, num_core_splits)

    def _data_idx(ci, j):
        # clamp the physical block index; logical masking in-kernel zeroes any
        # redundant / out-of-range block's contribution.
        return jnp.minimum(ci * per_core + j, grid_n - 1)

    kernel = functools.partial(_focal_loss_kernel, n_total=n, tile_n=tile,
                               per_core=per_core, gamma=gamma)

    itemsize = jnp.dtype(logits_cn.dtype).itemsize
    cost = pl.CostEstimate(
        flops=12 * n * c,
        transcendentals=n * (c + 2),
        bytes_accessed=n * c * itemsize + n * 4 + c * 4
                       + num_core_splits * 8 * 128 * 4,
    )

    cp_kwargs = dict(
        dimension_semantics=("parallel", "arbitrary"),
        vmem_limit_bytes=int(vmem_limit_bytes),
    )
    if allow_input_fusion:
        # Lets XLA fuse the (N,C)->(C,N) transpose into the pallas_call input.
        cp_kwargs["allow_input_fusion"] = [True, False, False]

    out = pl.pallas_call(
        kernel,
        out_shape=jax.ShapeDtypeStruct((num_core_splits * 8, 128), jnp.float32),
        grid_spec=pltpu.PrefetchScalarGridSpec(
            num_scalar_prefetch=0,
            grid=(num_core_splits, per_core),
            in_specs=[
                pl.BlockSpec((c, tile), lambda ci, j: (0, _data_idx(ci, j))),  # logits (C, N)
                pl.BlockSpec((1, tile), lambda ci, j: (0, _data_idx(ci, j))),  # targets (1, N)
                pl.BlockSpec((c, 1), lambda ci, j: (0, 0)),                    # alpha, resident
            ],
            out_specs=pl.BlockSpec((8, 128), lambda ci, j: (ci, 0)),           # per-core partial
            scratch_shapes=[pltpu.VMEM((1, tile), jnp.float32)],               # vector accumulator
        ),
        compiler_params=pltpu.CompilerParams(**cp_kwargs),
        cost_estimate=cost,
    )(logits_cn, targets_2d, alpha_2d)

    partials = out[0::8, 0]                    # one partial sum per core slice
    total = jnp.sum(partials)
    if reduction == "sum":
        return total
    return total / jnp.float32(n)              # reduction='mean'


if __name__ == "__main__":
    num_classes = 10   # MNIST
    batch = 8
    gamma = 2

    key = jax.random.PRNGKey(0)
    k_logits, k_targets = jax.random.split(key)
    logits = jax.random.normal(k_logits, (batch, num_classes), dtype=jnp.float32)
    targets = jax.random.randint(k_targets, (batch,), 0, num_classes, dtype=jnp.int32)

    # FocalLoss.__init__ with alpha=None -> torch.ones(num_classes, 1)
    alpha = jnp.ones((num_classes,), dtype=jnp.float32)

    # default (N, C) path (matches the PyTorch module interface)
    loss = focal_loss(logits, targets, alpha, gamma=gamma)
    jax.block_until_ready(loss)

    # zero-copy (C, N) fast path
    loss_cn = focal_loss(jnp.transpose(logits), targets, alpha, gamma=gamma,
                         logits_layout="cn")
    jax.block_until_ready(loss_cn)

    # Pure-JAX reference (same math as the PyTorch forward).
    p = jax.nn.softmax(logits, axis=1)
    mask = jax.nn.one_hot(targets, num_classes, dtype=jnp.float32)
    probs = jnp.sum(p * mask, axis=1, keepdims=True)
    a_ref = alpha[targets].reshape(-1, 1)
    ref = jnp.mean(-a_ref * (1.0 - probs) ** gamma * jnp.log(probs))
    assert jnp.allclose(loss, ref, rtol=1e-5, atol=1e-6), (loss, ref)
    assert jnp.allclose(loss_cn, ref, rtol=1e-5, atol=1e-6), (loss_cn, ref)

    print("KERNEL_OK")
</pallas_src>

<mosaic_0001>
module attributes {stable_mosaic.version = 11 : i64} {
  func.func @_focal_loss_kernel(%arg0: i32, %arg1: i32, %arg2: memref<10x8xf32, #tpu.memory_space<vmem>>, %arg3: memref<1x8xi32, #tpu.memory_space<vmem>>, %arg4: memref<10x1xf32, #tpu.memory_space<vmem>>, %arg5: memref<8x128xf32, #tpu.memory_space<vmem>>, %arg6: memref<1x8xf32, #tpu.memory_space<vmem>>) attributes {dimension_semantics = [#tpu.dimension_semantics<parallel>, #tpu.dimension_semantics<arbitrary>], iteration_bounds = array<i64: 2, 1>, scalar_prefetch = 0 : i64, scratch_operands = 1 : i64, tpu.core_type = #tpu.core_type<tc>, window_params = [{transform_indices = @transform_0, window_bounds = array<i64: 10, 8>}, {transform_indices = @transform_1, window_bounds = array<i64: 1, 8>}, {pipeline_mode = #tpu.pipeline_mode<synchronous>, transform_indices = @transform_2, window_bounds = array<i64: 10, 1>}, {transform_indices = @transform_3, window_bounds = array<i64: 8, 128>}]} {
    %c0_i32 = arith.constant 0 : i32
    %0 = arith.cmpi eq, %arg1, %c0_i32 : i32
    %1 = arith.extui %0 : i1 to i32
    %c0_i32_0 = arith.constant 0 : i32
    %2 = arith.cmpi ne, %1, %c0_i32_0 : i32
    scf.if %2 {
      %cst_20 = arith.constant 0.000000e+00 : f32
      %52 = vector.broadcast %cst_20 : f32 to vector<1x8xf32>
      %c0_21 = arith.constant 0 : index
      %c0_22 = arith.constant 0 : index
      %53 = vector.load %arg6[%c0_21, %c0_22] : memref<1x8xf32, #tpu.memory_space<vmem>>, vector<1x8xf32>
      tpu.vector_store %arg6[%c0_21, %c0_22], %52 {strides = array<i32>} : memref<1x8xf32, #tpu.memory_space<vmem>>, vector<1x8xf32>,
    } else {
    }
    %c0 = arith.constant 0 : index
    %c0_1 = arith.constant 0 : index
    %3 = vector.load %arg2[%c0, %c0_1] : memref<10x8xf32, #tpu.memory_space<vmem>>, vector<10x8xf32>
    %c0_2 = arith.constant 0 : index
    %c0_3 = arith.constant 0 : index
    %4 = vector.load %arg3[%c0_2, %c0_3] : memref<1x8xi32, #tpu.memory_space<vmem>>, vector<1x8xi32>
    %5 = tpu.iota {dimensions = array<i32: 0>} : vector<10x8xi32>
    %6 = vector.broadcast %4 : vector<1x8xi32> to vector<10x8xi32>
    %7 = arith.cmpi eq, %5, %6 : vector<10x8xi32>
    %cst = arith.constant dense<0xFF800000> : vector<8xf32>
    %8 = vector.multi_reduction <maximumf>, %3, %cst [0] : vector<10x8xf32> to vector<8xf32>
    %9 = vector.shape_cast %8 : vector<8xf32> to vector<1x8xf32>
    %10 = vector.broadcast %9 : vector<1x8xf32> to vector<10x8xf32>
    %11 = arith.subf %3, %10 : vector<10x8xf32>
    %12 = math.exp %11 : vector<10x8xf32>
    %cst_4 = arith.constant dense<0.000000e+00> : vector<8xf32>
    %13 = vector.multi_reduction <add>, %12, %cst_4 [0] : vector<10x8xf32> to vector<8xf32>
    %14 = vector.shape_cast %13 : vector<8xf32> to vector<1x8xf32>
    %15 = math.log %14 : vector<1x8xf32>
    %16 = arith.addf %9, %15 : vector<1x8xf32>
    %cst_5 = arith.constant 0.000000e+00 : f32
    %17 = vector.broadcast %cst_5 : f32 to vector<10x8xf32>
    %18 = arith.select %7, %3, %17 : vector<10x8xi1>, vector<10x8xf32>
    %cst_6 = arith.constant dense<0.000000e+00> : vector<8xf32>
    %19 = vector.multi_reduction <add>, %18, %cst_6 [0] : vector<10x8xf32> to vector<8xf32>
    %20 = vector.shape_cast %19 : vector<8xf32> to vector<1x8xf32>
    %c0_7 = arith.constant 0 : index
    %c0_8 = arith.constant 0 : index
    %21 = vector.load %arg4[%c0_7, %c0_8] : memref<10x1xf32, #tpu.memory_space<vmem>>, vector<10x1xf32>
    %cst_9 = arith.constant 0.000000e+00 : f32
    %22 = vector.shape_cast %21 : vector<10x1xf32> to vector<10x1xf32>
    %23 = vector.broadcast %22 : vector<10x1xf32> to vector<10x8xf32>
    %24 = vector.broadcast %cst_9 : f32 to vector<10x8xf32>
    %25 = arith.select %7, %23, %24 : vector<10x8xi1>, vector<10x8xf32>
    %cst_10 = arith.constant dense<0.000000e+00> : vector<8xf32>
    %26 = vector.multi_reduction <add>, %25, %cst_10 [0] : vector<10x8xf32> to vector<8xf32>
    %27 = vector.shape_cast %26 : vector<8xf32> to vector<1x8xf32>
    %28 = arith.subf %20, %16 : vector<1x8xf32>
    %29 = math.exp %28 : vector<1x8xf32>
    %cst_11 = arith.constant 1.000000e+00 : f32
    %30 = vector.broadcast %cst_11 : f32 to vector<1x8xf32>
    %31 = arith.subf %30, %29 : vector<1x8xf32>
    %cst_12 = arith.constant 1.000000e+00 : f32
    %32 = vector.broadcast %cst_12 : f32 to vector<1x8xf32>
    %33 = arith.mulf %32, %31 : vector<1x8xf32>
    %34 = arith.mulf %33, %31 : vector<1x8xf32>
    %cst_13 = arith.constant 0.000000e+00 : f32
    %35 = vector.broadcast %cst_13 : f32 to vector<1x8xf32>
    %36 = arith.subf %35, %27 : vector<1x8xf32>
    %37 = arith.mulf %36, %34 : vector<1x8xf32>
    %38 = arith.mulf %37, %28 : vector<1x8xf32>
    %c1_i32 = arith.constant 1 : i32
    %39 = arith.muli %arg0, %c1_i32 : i32
    %40 = arith.addi %39, %arg1 : i32
    %c8_i32 = arith.constant 8 : i32
    %41 = arith.muli %40, %c8_i32 : i32
    %c8_i32_14 = arith.constant 8 : i32
    %42 = arith.addi %41, %c8_i32_14 : i32
    %c8_i32_15 = arith.constant 8 : i32
    %43 = arith.cmpi sle, %42, %c8_i32_15 : i32
    %44 = arith.extui %43 : i1 to i32
    %c0_i32_16 = arith.constant 0 : i32
    %45 = arith.cmpi ne, %44, %c0_i32_16 : i32
    scf.if %45 {
      %c0_20 = arith.constant 0 : index
      %c0_21 = arith.constant 0 : index
      %52 = vector.load %arg6[%c0_20, %c0_21] : memref<1x8xf32, #tpu.memory_space<vmem>>, vector<1x8xf32>
      %53 = arith.addf %52, %38 : vector<1x8xf32>
      %c0_22 = arith.constant 0 : index
      %c0_23 = arith.constant 0 : index
      %54 = vector.load %arg6[%c0_22, %c0_23] : memref<1x8xf32, #tpu.memory_space<vmem>>, vector<1x8xf32>
      tpu.vector_store %arg6[%c0_22, %c0_23], %53 {strides = array<i32>} : memref<1x8xf32, #tpu.memory_space<vmem>>, vector<1x8xf32>,
    } else {
    }
    %true = arith.constant true
    %46 = arith.xori %43, %true : i1
    %47 = arith.extui %46 : i1 to i32
    %c0_i32_17 = arith.constant 0 : i32
    %48 = arith.cmpi ne, %47, %c0_i32_17 : i32
    scf.if %48 {
      %52 = tpu.iota {dimensions = array<i32: 1>} : vector<1x8xi32>
      %53 = vector.broadcast %41 : i32 to vector<1x8xi32>
      %54 = arith.addi %52, %53 : vector<1x8xi32>
      %c0_20 = arith.constant 0 : index
      %c0_21 = arith.constant 0 : index
      %55 = vector.load %arg6[%c0_20, %c0_21] : memref<1x8xf32, #tpu.memory_space<vmem>>, vector<1x8xf32>
      %c8_i32_22 = arith.constant 8 : i32
      %56 = vector.broadcast %c8_i32_22 : i32 to vector<1x8xi32>
      %57 = arith.cmpi slt, %54, %56 : vector<1x8xi32>
      %cst_23 = arith.constant 0.000000e+00 : f32
      %58 = vector.broadcast %cst_23 : f32 to vector<1x8xf32>
      %59 = arith.select %57, %38, %58 : vector<1x8xi1>, vector<1x8xf32>
      %60 = arith.addf %55, %59 : vector<1x8xf32>
      %c0_24 = arith.constant 0 : index
      %c0_25 = arith.constant 0 : index
      %61 = vector.load %arg6[%c0_24, %c0_25] : memref<1x8xf32, #tpu.memory_space<vmem>>, vector<1x8xf32>
      tpu.vector_store %arg6[%c0_24, %c0_25], %60 {strides = array<i32>} : memref<1x8xf32, #tpu.memory_space<vmem>>, vector<1x8xf32>,
    } else {
    }
    %c0_i32_18 = arith.constant 0 : i32
    %49 = arith.cmpi eq, %arg1, %c0_i32_18 : i32
    %50 = arith.extui %49 : i1 to i32
    %c0_i32_19 = arith.constant 0 : i32
    %51 = arith.cmpi ne, %50, %c0_i32_19 : i32
    scf.if %51 {
      %c0_20 = arith.constant 0 : index
      %c0_21 = arith.constant 0 : index
      %52 = vector.load %arg6[%c0_20, %c0_21] : memref<1x8xf32, #tpu.memory_space<vmem>>, vector<1x8xf32>
      %53 = vector.shape_cast %52 : vector<1x8xf32> to vector<1x1x8xf32>
      %cst_22 = arith.constant dense<0.000000e+00> : vector<1xf32>
      %54 = vector.multi_reduction <add>, %53, %cst_22 [1, 2] : vector<1x1x8xf32> to vector<1xf32>
      %55 = vector.shape_cast %54 : vector<1xf32> to vector<1x1x1xf32>
      %56 = vector.extract %55[0, 0, 0] : f32 from vector<1x1x1xf32>
      %57 = vector.broadcast %56 : f32 to vector<1x1xf32>
      %58 = vector.shape_cast %57 : vector<1x1xf32> to vector<1x1xf32>
      %59 = vector.broadcast %58 : vector<1x1xf32> to vector<8x128xf32>
      %c0_23 = arith.constant 0 : index
      %c0_24 = arith.constant 0 : index
      %60 = vector.load %arg5[%c0_23, %c0_24] : memref<8x128xf32, #tpu.memory_space<vmem>>, vector<8x128xf32>
      tpu.vector_store %arg5[%c0_23, %c0_24], %59 {strides = array<i32>} : memref<8x128xf32, #tpu.memory_space<vmem>>, vector<8x128xf32>,
    } else {
    }
    return
  }
  func.func @transform_0(%arg0: i32, %arg1: i32) -> (i32, i32) {
    %c1_i32 = arith.constant 1 : i32
    %0 = arith.muli %arg0, %c1_i32 : i32
    %1 = arith.addi %0, %arg1 : i32
    %c0_i32 = arith.constant 0 : i32
    %2 = arith.minsi %1, %c0_i32 : i32
    %c0_i32_0 = arith.constant 0 : i32
    %c0_i32_1 = arith.constant 0 : i32
    return %c0_i32_0, %2 : i32, i32
  }
  func.func @transform_1(%arg0: i32, %arg1: i32) -> (i32, i32) {
    %c1_i32 = arith.constant 1 : i32
    %0 = arith.muli %arg0, %c1_i32 : i32
    %1 = arith.addi %0, %arg1 : i32
    %c0_i32 = arith.constant 0 : i32
    %2 = arith.minsi %1, %c0_i32 : i32
    %c0_i32_0 = arith.constant 0 : i32
    %c0_i32_1 = arith.constant 0 : i32
    return %c0_i32_0, %2 : i32, i32
  }
  func.func @transform_2(%arg0: i32, %arg1: i32) -> (i32, i32) {
    %c0_i32 = arith.constant 0 : i32
    %c0_i32_0 = arith.constant 0 : i32
    %c0_i32_1 = arith.constant 0 : i32
    return %c0_i32, %c0_i32_0 : i32, i32
  }
  func.func @transform_3(%arg0: i32, %arg1: i32) -> (i32, i32) {
    %c0_i32 = arith.constant 0 : i32
    %c0_i32_0 = arith.constant 0 : i32
    return %arg0, %c0_i32 : i32, i32
  }
}

</mosaic_0001>

<bundles_post_ra>
// kernel: tpu_custom_call.1
= control target key start
LH: loop header
LB: loop body
LE: loop exit
PB: predicated region body
PF: predicated region fallthrough
CT: control target
= control target key end

     0   :  { %8 = vsyncpa [#allocation4], 0  ;;  %s808_s0 = inlined_call_operand.vmem [shape: f32[10,8], index: 0, kind: input, shape index: {}]   ;;  %s809_s1 = inlined_call_operand.vmem [shape: s32[1,8], index: 1, kind: input, shape index: {}]   ;;  %s810_s2 = inlined_call_operand.vmem [shape: f32[10,1], index: 2, kind: input, shape index: {}]   ;;  %s811_s3 = inlined_call_operand.hbm [shape: f32[16,128], index: 3, kind: output, shape index: {}]  }
   0x1   :  { %10 = vsyncpa [#allocation4 + $0x1], 0  ;;  %s647_s12 = smov 0   ;;  %s649_s13 = smov 0  }
   0x2   :  { %s651_s14 = smov 0   ;;  %s653_s15 = smov 0  }
   0x3   :  { %s655_s16 = smov 0   ;;  %s657_s17 = smov 0  }
   0x4 LB: > { %s455_s18 = sadd.s32 4294967295, %s622_s17   ;;  %s456_s19 = sadd.s32 4294967294, %s622_s17   ;;  %s622_s17 = sphi %s657_s17, %s16_s17   ;;  %s618_s16 = sphi %s655_s16, %s818_s16   ;;  %s614_s15 = sphi %s653_s15, %s817_s15   ;;  %s610_s14 = sphi %s651_s14, %s816_s14   ;;  %s606_s13 = sphi %s649_s13, %s815_s13   ;;  %s602_s12 = sphi %s647_s12, %s814_s12  }
   0x5   : > { %s28_s20 = sadd.s32 1, %s618_s16  ;;  %s120_s21 = sadd.s32 1, %s610_s14 }
   0x6   : > { %p30_p0 = scmp.ge.s32.totalorder %s28_s20, 2  ;;  %p130_p1 = scmp.ne.s32.totalorder %s610_s14, %s606_s13 }
   0x7   : > { %p131_p2 = scmp.eq.s32.totalorder %s455_s18, 1  ;;  %p136_p3 = scmp.ne.s32.totalorder %s606_s13, %s602_s12 }
   0x8   : > { %s820_s20 = smov (%p30_p0, %s28_s20), 0  ;;  %p137_p5 = scmp.eq.s32.totalorder %s456_s19, 1 }
   0x9   : > { %p687_p4 = por %p131_p2, %p130_p1  ;;  %s117_s23 = ssub.s32 %s618_s16, %s820_s20 }
   0xa   : > { %p459_p6 = scmp.ge.s32.totalorder %s622_s17, 1  ;;  %p118_p7 = scmp.eq.s32.totalorder %s117_s23, 0 }
   0xb   : > { %p694_p8 = por %p137_p5, %p136_p3  ;;  %p183_p9 = scmp.lt.s32.totalorder %s622_s17, 3 }
   0xc   : > { %s700_s25 = scalar_select %p118_p7, %s610_s14, %s120_s21  }
   0xd   : > { %p184_p10 = pnand %p459_p6, %p183_p9 }
   0xe   : > { %v292_v0 = vld [vmem:[%s810_s2] sm:$0xff] (!%p184_p10)  ;;  %p216_p11 = scmp.lt.s32.totalorder (!%p184_p10), %s614_s15, 0  ;;  %v624_v1 = vmov (!%p184_p10), 0   ;;  %v293_v2 = vld [vmem:[%s810_s2 + $0x8] sm:$0x3] (!%p184_p10)  ;;  %vm252_vm0 = vcmask (!%p184_p10), 64512   ;;  %v243_v23 = vlaneseq (!%p184_p10) }
   0xf   : > { %187 = sbr.rel (%p184_p10) target bundleno = 410 (0x19a), region = 32  ;;  %535 = vset.pattern.permute.xlu0 (!%p184_p10), %v624_v1  ;;  %vm254_vm1 = vcmask (!%p184_p10), 58368   ;;  %s212_s8 = sand.u32 (!%p184_p10), 1, %s606_s13   ;;  %vm238_vm2 = vcmask (!%p184_p10), 57344   ;;  %v625_v9 = vmov (!%p184_p10), 0.0  }
  0x10   : > { %296 = vperm.xlu0 (!%p184_p10), %535, %v292_v0   ;;  %s721_s9 = sshll.u32 (!%p184_p10), %s212_s8, 3  ;;  %s469_s10 = sshll.u32 (!%p184_p10), %s614_s15, 3  ;;  %239 = vst.msk [vmem:[#allocation2] sm:$0x1] (!%p184_p10), %vm238_vm2, %v625_v9  ;;  %v244_v25 = vshrl.u32 (!%p184_p10), %v243_v23, 7 }
  0x11   : > { %s727_s11 = sadd.s32 (!%p184_p10), 8, %s469_s10  ;;  %s214_s23 = scalar_lea.vmem (!%p184_p10), [#allocation3], %s721_s9 }
  0x12   : > { %v245_v27 = vadd.s32 (!%p184_p10), 8, %v244_v25  ;;  %p470_p12 = scmp.gt.s32.totalorder (!%p184_p10), %s727_s11, 8 }
  0x14   : > { %301 = vperm.xlu0 (!%p184_p10), %535, %v293_v2  }
  0x16   : > { %s217_s28 = scalar_select %p216_p11, %s614_s15, 0 }
  0x18   : > { %s822_s28 = smov (!%p216_p11, %s217_s28), 0 }
  0x19   : > { %s464_s4 = sshll.u32 %s822_s28, 3  ;;  %s230_s21 = scalar_lea.vmem %s809_s1, %s822_s28 }
  0x1a   : > { %s221_s7 = scalar_lea.vmem %s808_s0, %s464_s4  ;;  %v468_v29 = vld [vmem:[%s230_s21] ss:$0 sm:$0xff] }
  0x1b   : > { %v240_v3 = vld [vmem:[%s221_s7] sm:$0xff]  ;;  %v241_v4 = vld [vmem:[%s221_s7 + $0x8] sm:$0x3]  ;;  %vm250_vm3 = vcmp.eq.s32.totalorder %v244_v25, %v468_v29  ;;  %vm251_vm4 = vcmp.eq.s32.totalorder %v245_v27, %v468_v29 }
  0x1c   : > { %v253_v5 = vsel %vm252_vm0, %v240_v3, -inf  ;;  %v255_v6 = vsel %vm254_vm1, %v241_v4, -inf  ;;  %v281_v31 = vsel %vm250_vm3, %v240_v3, 0.0  ;;  %v282_v32 = vsel %vm251_vm4, %v241_v4, 0.0 }
  0x1d   : > { %v256_v7 = vmax.f32 %v253_v5, %v255_v6  ;;  %v283_v34 = vsel %vm252_vm0, %v281_v31, 0.0  ;;  %v284_v35 = vsel %vm254_vm1, %v282_v32, 0.0  ;;  %v330_v5 = vld [vmem:[#allocation2] sm:$0x1] (!%p470_p12) }
  0x1e   : > { %v285_v37 = vadd.f32 %v284_v35, %v283_v34 }
  0x1f   : > { %v257_v8 = vrot.slane %v256_v7, 4 }
  0x20   : > { %v286_v39 = vrot.slane %v285_v37, 4 }
  0x21   : > { %v258_v10 = vmax.f32 %v256_v7, %v257_v8 }
  0x22   : > { %v287_v40 = vadd.f32 %v286_v39, %v285_v37 }
  0x23   : > { %v259_v11 = vrot.slane %v258_v10, 2 }
  0x24   : > { %v288_v41 = vrot.slane %v287_v40, 2 }
  0x25   : > { %v260_v12 = vmax.f32 %v258_v10, %v259_v11 }
  0x26   : > { %v289_v42 = vadd.f32 %v288_v41, %v287_v40 }
  0x27   : > { %v261_v13 = vrot.slane %v260_v12, 1 }
  0x28   : > { %v290_v45 = vrot.slane %v289_v42, 1 }
  0x29   : > { %v262_v14 = vmax.f32 %v260_v12, %v261_v13 }
  0x2a   : > { %v291_v47 = vadd.f32 %v290_v45, %v289_v42 }
  0x2b   : > { %v263_v15 = vsub.f32 %v240_v3, %v262_v14  ;;  %v264_v16 = vsub.f32 %v241_v4, %v262_v14 }
  0x2d   : > { %v265_v17 = vmul.f32 1.442695, %v263_v15  ;;  %v267_v18 = vmul.f32 1.442695, %v264_v16 }
  0x2f   : > { %536 = vpow2.f32 %v265_v17 }
  0x30   : > { %538 = vpow2.f32 %v267_v18 }
  0x39   : > { %v537_v19 = vpop.eup %536 }
  0x3a   : > { %v539_v20 = vpop.eup %538  ;;  %v269_v21 = vsel %vm252_vm0, %v537_v19, 0.0 }
  0x3b   : > { %v270_v22 = vsel %vm254_vm1, %v539_v20, 0.0 }
  0x3c   : > { %v271_v24 = vadd.f32 %v270_v22, %v269_v21 }
  0x3e   : > { %v272_v26 = vrot.slane %v271_v24, 4 }
  0x40   : > { %v273_v28 = vadd.f32 %v272_v26, %v271_v24 }
  0x42   : > { %v274_v30 = vrot.slane %v273_v28, 2 }
  0x44   : > { %v275_v33 = vadd.f32 %v274_v30, %v273_v28 }
  0x46   : > { %v276_v36 = vrot.slane %v275_v33, 1 }
  0x48   : > { %v277_v38 = vadd.f32 %v276_v36, %v275_v33 }
  0x4a   : > { %540 = vlog2.f32 %v277_v38 }
  0x54   : > { %v541_v43 = vpop.eup %540 }
  0x55   : > { %v279_v44 = vmul.f32 0.6931472, %v541_v43 }
  0x57   : > { %v280_v46 = vadd.f32 %v279_v44, %v262_v14 }
  0x59   : > { %v315_v48 = vsub.f32 %v291_v47, %v280_v46 }
  0x5b   : > { %v316_v49 = vmul.f32 1.442695, %v315_v48 }
  0x5d   : > { %542 = vpow2.f32 %v316_v49 }
  0x67   : > { %v543_v59 = vpop.eup %542 }
  0x68   : > { %v318_v62 = vsub.f32 1.0, %v543_v59 }
  0x6a   : > { %v319_v1 = vmul.f32 %v318_v62, %v318_v62 }
  0x8f   : > { %v297_v50 = vpop.permute.xlu0 %296 }
  0x90   : > { %v304_v51 = vsel %vm250_vm3, %v297_v50, 0.0 }
  0x91   : > { %v306_v54 = vsel %vm252_vm0, %v304_v51, 0.0 }
  0x93   : > { %v302_v52 = vpop.permute.xlu0 %301 }
  0x94   : > { %v305_v53 = vsel %vm251_vm4, %v302_v52, 0.0 }
  0x95   : > { %v307_v55 = vsel %vm254_vm1, %v305_v53, 0.0 }
  0x96   : > { %v308_v56 = vadd.f32 %v307_v55, %v306_v54 }
  0x98   : > { %v309_v57 = vrot.slane %v308_v56, 4 }
  0x9a   : > { %v310_v58 = vadd.f32 %v309_v57, %v308_v56 }
  0x9c   : > { %v311_v60 = vrot.slane %v310_v58, 2 }
  0x9e   : > { %v312_v61 = vadd.f32 %v311_v60, %v310_v58 }
  0xa0   : > { %v313_v63 = vrot.slane %v312_v61, 1 }
  0xa2   : > { %v314_v0 = vadd.f32 %v313_v63, %v312_v61  ;;  %329 = sbr.rel (%p470_p12) target bundleno = 173 (0xad), region = 40 }
  0xa4   : > { %v320_v2 = vsub.f32 0.0, %v314_v0 }
  0xa6   : > { %v321_v3 = vmul.f32 %v320_v2, %v319_v1 }
  0xa8   : > { %v322_v4 = vmul.f32 %v321_v3, %v315_v48 }
  0xaa   : > { %v331_v6 = vadd.f32 %v330_v5, %v322_v4 }
  0xac   : > { %333 = vst.msk [vmem:[#allocation2] sm:$0x1] %vm238_vm2, %v331_v6 }
  0xad PF: > { %p471_p13 = scmp.le.s32.totalorder %s727_s11, 8 }
  0xae   : > { %v339_v7 = vand.u32 (!%p471_p13), 127, %v243_v23  ;;  %v340_v8 = vstv (!%p471_p13), %s469_s10 }
  0xaf   : > { %337 = sbr.rel (%p471_p13) target bundleno = 183 (0xb7), region = 44 }
  0xb0   : > { %v341_v9 = vadd.s32 (!%p471_p13), %v340_v8, %v339_v7 }
  0xb2   : > { %vm343_vm5 = vcmp.lt.s32.totalorder (!%p471_p13), %v341_v9, 8 }
  0xb3   : > { %v342_v10 = vld [vmem:[#allocation2] sm:$0x1] (!%p471_p13)  ;;  %v344_v11 = vsel (!%p471_p13), %vm343_vm5, %v322_v4, 0.0 }
  0xb4   : > { %v345_v12 = vadd.f32 (!%p471_p13), %v344_v11, %v342_v10 }
  0xb6   : > { %347 = vst.msk [vmem:[#allocation2] sm:$0x1] %vm238_vm2, %v345_v12 }
  0xb7 PF: > { %s473_s26 = sshll.u32 %s614_s15, 7  ;;  %s379_s27 = sshll.u32 %s214_s23, 4  ;;  %s759_s27 = int_to_ptr.vmem [resolvable:$true] %s379_s27 }
  0xb8   : > { %s757_s30 = scalar_lea.hbm %s811_s3, %s473_s26  ;;  %s366_s5 = scalar_lea.sflag [#allocation4], %s212_s8 }
  0xb9   : > { %s544_s6 = scalar_lea.vmem %s759_s27, 128  ;;  %s626_s15 = smov [#allocation3]  }
  0xba   : > { %p545_p0 = scmp.ne.s32.totalorder %s759_s27, %s544_s6  ;;  %s548_s7 = sshll.u32 %s626_s15, 4  ;;  %s549_s7 = int_to_ptr.vmem [resolvable:$false] %s548_s7 }
  0xbb   : > { %s550_s10 = scalar_lea.vmem %s549_s7, 256  ;;  %p551_p3 = scmp.lt.s32.totalorder %s759_s27, %s549_s7 }
  0xbc   : > { %p546_p1 = pnand %p545_p0, %p687_p4  ;;  %p552_p5 = scmp.lt.s32.totalorder %s550_s10, %s544_s6 }
  0xbd   : > { %v351_v13 = vld [vmem:[#allocation2] sm:$0x1] }
  0xbe   : > { %v353_v14 = vsel %vm238_vm2, %v351_v13, 0.0  ;;  %p547_p2 = pneg %p546_p1  ;;  %p553_p6 = por %p552_p5, %p551_p3 }
  0xbf   : > { %354 = vadd.xlane.f32.xlu0 %v353_v14 }
  0xc0   : > { %p554_p7 = pnand %p553_p6, %p547_p2 }
 0x14c   : > { %v355_v15 = vpop.xlane.xlu0 %354 }
 0x14d   : > { %v356_v16 = vrot.slane %v355_v15, 4 }
 0x14f   : > { %v357_v17 = vadd.f32 %v356_v16, %v355_v15 }
 0x151   : > { %v358_v18 = vrot.slane %v357_v17, 2 }
 0x153   : > { %v359_v19 = vadd.f32 %v358_v18, %v357_v17 }
 0x155   : > { %v360_v20 = vrot.slane %v359_v19, 1 }
 0x157   : > { %v361_v21 = vadd.f32 %v360_v20, %v359_v19 }
 0x159   : > { %476 = vpush %v361_v21 }
 0x18a   : > { %s477_s4 = spop %476 }
 0x18b   : > { %v363_v22 = vstv %s477_s4 }
 0x18c   : > { %364 = vst [vmem:[%s214_s23] sm:$0xff] %v363_v22 }
 0x18d   : > { %557 = shalt.err (!%p554_p7)
}
 0x18e   : > { %s558_s8 = scalar_lea.hbm %s757_s30, 128  ;;  %s562_s18 = scalar_lea.hbm %s811_s3, 256 }
 0x18f   : > { %p559_p9 = scmp.ne.s32.totalorder %s757_s30, %s558_s8  ;;  %p563_p12 = scmp.lt.u32.totalorder %s757_s30, %s811_s3 }
 0x190   : > { %p564_p13 = scmp.lt.u32.totalorder %s562_s18, %s558_s8  ;;  %p566_p1 = scmp.lt.u32.totalorder %s558_s8, %s757_s30 }
 0x191   : > { %p560_p10 = pnand %p559_p9, %p687_p4 }
 0x192   : > { %p565_p0 = por %p564_p13, %p563_p12 }
 0x193   : > { %p561_p11 = pneg %p560_p10 }
 0x194   : > { %p567_p2 = por %p566_p1, %p565_p0 }
 0x196   : > { %p568_p3 = pnand %p567_p2, %p561_p11 }
 0x198   : > { %571 = shalt.err (!%p568_p3)
}
 0x199   : > { %478 = dma.vmem_to_hbm [thread:$0]  (%p687_p4), %s759_s27, 128, %s757_s30, %s366_s5  }
 0x19a PF: > { %p484_p5 = scmp.ge.s32.totalorder %s622_s17, 2  ;;  %s391_s23 = sand.u32 1, %s602_s12  }
 0x19b   : > { %s392_s26 = scalar_lea.sflag [#allocation4], %s391_s23 }
 0x19c   : > { %p481_p6 = pnand %p484_p5, %p694_p8 }
 0x19e   : > { %597 = dma.done.wait (!%p481_p6), %s392_s26, 128  }
 0x19f   : > { %599 = vsyncadd (!%p481_p6), %s392_s26, 4294967168  ;;  %s16_s17 = sadd.s32 1, %s622_s17   ;;  %s814_s12 = smov %s606_s13 }
 0x1a0   : > { %p13_p7 = scmp.ge.s32.totalorder %s16_s17, 4   ;;  %s815_s13 = smov %s610_s14 }
 0x1a1   : > { %s816_s14 = smov %s700_s25  ;;  %s817_s15 = smov %s618_s16 }
 0x1a2   : > { %s818_s16 = smov %s820_s20  ;;  %15 = sbr.rel (!%p13_p7) target bundleno = 4 (0x4), region = 86 }
 0x1a9   :  { %397 = vsyncpa [#allocation4], 1 }
 0x1aa   :  { %399 = vsyncpa [#allocation4 + $0x1], 1 }

</bundles_post_ra>
